<compile_context>
chip_gen: v7x
topology: tpu7x:2x2x1
jax: 0.10.0
libtpu: 0.0.40
codegen_flags: <defaults>
</compile_context>

<pallas_src>
import jax
import jax.numpy as jnp
from jax.experimental import pallas as pl
from jax.experimental.pallas import tpu as pltpu

ACT_BITS = 6
WEIGHT_BITS = 6
BIAS_BITS = 6

_QMAX_A = 2.0 ** (ACT_BITS - 1) - 1.0     # 31
_QMAX_W = 2.0 ** (WEIGHT_BITS - 1) - 1.0  # 31
_QMAX_B = 2.0 ** (BIAS_BITS - 1) - 1.0    # 31
_EPS = 1e-8


def _round_up(a, m):
    return ((a + m - 1) // m) * m


def _make_kernel(n_out, out_pad):
    """Fused quantized-MLP kernel for one batch tile (feature-major layout)."""

    def kernel(x_ref, ws_ref, w1_ref, b1_ref, w2_ref, b2_ref,
               w3_ref, b3_ref, w4_ref, b4_ref, o_ref):

        def quant_act(y, already_nonneg):
            # Symmetric fake-quant; returns integer-valued activations, scale,
            # and 1/scale (the inverse is reused for the bias quantization).
            a = y if already_nonneg else jnp.abs(y)      # ReLU output -> abs redundant
            amax = jnp.maximum(jnp.max(a), _EPS)
            inv_scale = _QMAX_A / amax                   # one scalar divide per layer
            scale = amax * (1.0 / _QMAX_A)
            y_int = jnp.clip(jnp.round(y * inv_scale), -_QMAX_A - 1.0, _QMAX_A)
            return y_int, scale, inv_scale

        def quant_dense(h_int, scale, inv_scale, wT_ref, b_ref, layer_idx):
            # HAWQ QuantLinear: integer matmul with pre-quantized (out,in) weights.
            # b_ref already holds bias / w_scale (pre-divided in the wrapper).
            w_scale = ws_ref[layer_idx]                  # SMEM scalar read
            b_int = jnp.clip(jnp.round(b_ref[...] * inv_scale),
                             -_QMAX_B - 1.0, _QMAX_B)    # (out, 1)
            acc = jnp.dot(wT_ref[...], h_int.astype(jnp.bfloat16),
                          preferred_element_type=jnp.float32)   # (out, TB)
            return (acc + b_int) * (w_scale * scale)

        # quant_input -> dense_1 -> relu -> quant_act_1 -> ... -> dense_4 -> softmax
        x_int, s, inv_s = quant_act(x_ref[...], already_nonneg=False)
        h = quant_dense(x_int, s, inv_s, w1_ref, b1_ref, 0)
        h_int, s, inv_s = quant_act(jnp.maximum(h, 0.0), already_nonneg=True)
        h = quant_dense(h_int, s, inv_s, w2_ref, b2_ref, 1)
        h_int, s, inv_s = quant_act(jnp.maximum(h, 0.0), already_nonneg=True)
        h = quant_dense(h_int, s, inv_s, w3_ref, b3_ref, 2)
        h_int, s, inv_s = quant_act(jnp.maximum(h, 0.0), already_nonneg=True)
        logits = quant_dense(h_int, s, inv_s, w4_ref, b4_ref, 3)   # (out_pad, TB)

        # Softmax over the class (sublane) axis; mask zero-padded class rows.
        if out_pad > n_out:
            row = jax.lax.broadcasted_iota(jnp.int32, logits.shape, 0)
            logits = jnp.where(row < n_out, logits, -1e30)
        m = jnp.max(logits, axis=0, keepdims=True)
        e = jnp.exp(logits - m)
        denom = jnp.sum(e, axis=0, keepdims=True)
        o_ref[...] = e * (1.0 / denom)      # exact reciprocal -> rows sum to 1

    return kernel


def _quantize_weights(padded_params):
    """Wrapper-side static weight quantization (hoisted out of the kernel).

    Returns per-layer weight scales (shape (4,)) and a flat list of
    [wT_int_bf16 (out,in), bias/w_scale (out,1)] per layer.
    """
    w_scales, qparams = [], []
    for w, b in zip(padded_params[0::2], padded_params[1::2]):
        w = w.astype(jnp.float32)                         # (in, out)
        b = b.astype(jnp.float32).reshape(-1)             # (out,)
        w_scale = jnp.maximum(jnp.max(jnp.abs(w)), _EPS) / _QMAX_W
        wT_int = jnp.clip(jnp.round(w.T / w_scale), -_QMAX_W - 1.0, _QMAX_W)
        qparams.append(wT_int.astype(jnp.bfloat16))       # |int| <= 32 -> exact in bf16
        qparams.append((b / w_scale).reshape(-1, 1))      # bias pre-divided by w_scale
        w_scales.append(w_scale)
    return jnp.stack(w_scales).astype(jnp.float32), qparams


def qthreelayer_forward(x, params, *, block_b=4096):
    """params = (w1, b1, w2, b2, w3, b3, w4, b4); weights (in, out), biases (1, out)."""
    w1, b1, w2, b2, w3, b3, w4, b4 = params
    B, f_in = x.shape
    n_out = w4.shape[1]

    ws = [w1, w2, w3, w4]
    bs = [b1, b2, b3, b4]
    in_dims = [f_in] + [w.shape[1] for w in ws[:-1]]
    pad_in = [_round_up(d, 8) for d in in_dims]
    pad_out = pad_in[1:] + [_round_up(max(n_out, 8), 8)]
    f_in_pad, out_pad = pad_in[0], pad_out[-1]

    # Zero-pad layer widths to sublane multiples (padded rows/cols contribute 0).
    padded = []
    for w, b, pi, po in zip(ws, bs, pad_in, pad_out):
        w = jnp.pad(w.astype(jnp.float32),
                    ((0, pi - w.shape[0]), (0, po - w.shape[1])))
        b = jnp.pad(b.astype(jnp.float32).reshape(1, -1),
                    ((0, 0), (0, po - b.shape[-1])))
        padded += [w, b]

    w_scales, qp = _quantize_weights(padded)

    # Batch tiling: TB lanes per grid step; weights/biases/scales stay resident.
    b128 = _round_up(B, 128)
    tb = min(block_b, b128)
    if b128 >= 2 * 128:
        # Keep >= 2 grid steps so the "parallel" batch axis can use both v7x TCs.
        tb = min(tb, _round_up((b128 + 1) // 2, 128))
    b_pad = _round_up(b128, tb)

    # Feature-major input: (f_in, B).  Feature rows padded with zeros (they hit
    # zero weight columns), batch lanes padded by replicating the last real
    # sample so padded lanes never raise the per-tile activation range.
    xT = x.astype(jnp.float32).T
    xT = jnp.pad(xT, ((0, f_in_pad - f_in), (0, 0)))
    if b_pad > B:
        xT = jnp.pad(xT, ((0, 0), (0, b_pad - B)), mode="edge")

    def resident(shape):
        return pl.BlockSpec(shape, lambda i: (0,) * len(shape))

    kernel = _make_kernel(n_out, out_pad)
    outT = pl.pallas_call(
        kernel,
        out_shape=jax.ShapeDtypeStruct((out_pad, b_pad), jnp.float32),
        grid=(b_pad // tb,),
        in_specs=[pl.BlockSpec((f_in_pad, tb), lambda i: (0, i)),
                  pl.BlockSpec(memory_space=pltpu.MemorySpace.SMEM)]
                 + [resident(p.shape) for p in qp],
        out_specs=pl.BlockSpec((out_pad, tb), lambda i: (0, i)),
        compiler_params=pltpu.CompilerParams(
            dimension_semantics=("parallel",)),
    )(xT, w_scales, *qp)
    return outT.T[:B, :n_out]


def _ref_forward(x, params):
    """Pure-JAX reference (same fake-quant math / operation ordering, exact softmax)."""
    w1, b1, w2, b2, w3, b3, w4, b4 = params

    def quant_act(y):
        amax = jnp.maximum(jnp.max(jnp.abs(y)), _EPS)
        inv = _QMAX_A / amax
        scale = amax * (1.0 / _QMAX_A)
        return jnp.clip(jnp.round(y * inv), -_QMAX_A - 1.0, _QMAX_A), scale, inv

    def qdense(x_int, scale, inv, w, b):
        w_scale = jnp.maximum(jnp.max(jnp.abs(w)), _EPS) / _QMAX_W
        w_int = jnp.clip(jnp.round(w / w_scale), -_QMAX_W - 1.0, _QMAX_W)
        b_int = jnp.clip(jnp.round((b / w_scale) * inv), -_QMAX_B - 1.0, _QMAX_B)
        return (x_int @ w_int + b_int) * (w_scale * scale)

    xi, s, inv = quant_act(x)
    h = jnp.maximum(qdense(xi, s, inv, w1, b1), 0.0)
    hi, s, inv = quant_act(h)
    h = jnp.maximum(qdense(hi, s, inv, w2, b2), 0.0)
    hi, s, inv = quant_act(h)
    h = jnp.maximum(qdense(hi, s, inv, w3, b3), 0.0)
    hi, s, inv = quant_act(h)
    logits = qdense(hi, s, inv, w4, b4)
    return jax.nn.softmax(logits, axis=1)


def _init_linear(key, fan_in, fan_out):
    """Deterministic nn.Linear-like init: U(-1/sqrt(fan_in), 1/sqrt(fan_in))."""
    kw, kb = jax.random.split(key)
    bound = 1.0 / jnp.sqrt(jnp.float32(fan_in))
    w = jax.random.uniform(kw, (fan_in, fan_out), jnp.float32, -bound, bound)
    b = jax.random.uniform(kb, (1, fan_out), jnp.float32, -bound, bound)
    return w, b


if __name__ == "__main__":
    key = jax.random.PRNGKey(0)
    k_x, k1, k2, k3, k4 = jax.random.split(key, 5)

    # Jet-tagging three-hidden-layer MLP: 16 -> 64 -> 32 -> 32 -> 5
    B, F_IN = 8, 16
    dims = [(16, 64), (64, 32), (32, 32), (32, 5)]

    x = jax.random.normal(k_x, (B, F_IN), jnp.float32)
    w1, b1 = _init_linear(k1, *dims[0])
    w2, b2 = _init_linear(k2, *dims[1])
    w3, b3 = _init_linear(k3, *dims[2])
    w4, b4 = _init_linear(k4, *dims[3])
    params = (w1, b1, w2, b2, w3, b3, w4, b4)

    out = qthreelayer_forward(x, params)
    out = jax.block_until_ready(out)
    ref = _ref_forward(x, params)

    assert out.shape == (B, 5)
    assert bool(jnp.all(jnp.isfinite(out)))
    # softmax rows sum to ~1 (exact reciprocal in the kernel epilogue)
    assert bool(jnp.allclose(jnp.sum(out, axis=1), 1.0, atol=1e-3))
    # matches the pure-JAX reference of the same fake-quant forward
    assert bool(jnp.allclose(out, ref, atol=1e-2)), float(jnp.max(jnp.abs(out - ref)))

    print("KERNEL_OK")
</pallas_src>

<mosaic_0001>
module attributes {stable_mosaic.version = 11 : i64} {
  func.func @kernel(%arg0: i32, %arg1: memref<16x128xf32, #tpu.memory_space<vmem>>, %arg2: memref<4xf32, #tpu.memory_space<smem>>, %arg3: memref<64x16xbf16, #tpu.memory_space<vmem>>, %arg4: memref<64x1xf32, #tpu.memory_space<vmem>>, %arg5: memref<32x64xbf16, #tpu.memory_space<vmem>>, %arg6: memref<32x1xf32, #tpu.memory_space<vmem>>, %arg7: memref<32x32xbf16, #tpu.memory_space<vmem>>, %arg8: memref<32x1xf32, #tpu.memory_space<vmem>>, %arg9: memref<8x32xbf16, #tpu.memory_space<vmem>>, %arg10: memref<8x1xf32, #tpu.memory_space<vmem>>, %arg11: memref<8x128xf32, #tpu.memory_space<vmem>>) attributes {dimension_semantics = [#tpu.dimension_semantics<parallel>], iteration_bounds = array<i64: 1>, scalar_prefetch = 0 : i64, scratch_operands = 0 : i64, tpu.core_type = #tpu.core_type<tc>, window_params = [{transform_indices = @transform_0, window_bounds = array<i64: 16, 128>}, {transform_indices = @transform_1, window_bounds = array<i64: 4>}, {pipeline_mode = #tpu.pipeline_mode<synchronous>, transform_indices = @transform_2, window_bounds = array<i64: 64, 16>}, {pipeline_mode = #tpu.pipeline_mode<synchronous>, transform_indices = @transform_3, window_bounds = array<i64: 64, 1>}, {pipeline_mode = #tpu.pipeline_mode<synchronous>, transform_indices = @transform_4, window_bounds = array<i64: 32, 64>}, {pipeline_mode = #tpu.pipeline_mode<synchronous>, transform_indices = @transform_5, window_bounds = array<i64: 32, 1>}, {pipeline_mode = #tpu.pipeline_mode<synchronous>, transform_indices = @transform_6, window_bounds = array<i64: 32, 32>}, {pipeline_mode = #tpu.pipeline_mode<synchronous>, transform_indices = @transform_7, window_bounds = array<i64: 32, 1>}, {pipeline_mode = #tpu.pipeline_mode<synchronous>, transform_indices = @transform_8, window_bounds = array<i64: 8, 32>}, {pipeline_mode = #tpu.pipeline_mode<synchronous>, transform_indices = @transform_9, window_bounds = array<i64: 8, 1>}, {transform_indices = @transform_10, window_bounds = array<i64: 8, 128>}]} {
    %c0 = arith.constant 0 : index
    %c0_0 = arith.constant 0 : index
    %0 = vector.load %arg1[%c0, %c0_0] : memref<16x128xf32, #tpu.memory_space<vmem>>, vector<16x128xf32>
    %1 = math.absf %0 : vector<16x128xf32>
    %2 = vector.shape_cast %1 : vector<16x128xf32> to vector<1x16x128xf32>
    %cst = arith.constant dense<0xFF800000> : vector<1xf32>
    %3 = vector.multi_reduction <maximumf>, %2, %cst [1, 2] : vector<1x16x128xf32> to vector<1xf32>
    %4 = vector.shape_cast %3 : vector<1xf32> to vector<1x1x1xf32>
    %5 = vector.extract %4[0, 0, 0] : f32 from vector<1x1x1xf32>
    %cst_1 = arith.constant 9.99999993E-9 : f32
    %6 = arith.maximumf %5, %cst_1 : f32
    %cst_2 = arith.constant 3.100000e+01 : f32
    %7 = arith.divf %cst_2, %6 : f32
    %cst_3 = arith.constant 0.0322580636 : f32
    %8 = arith.mulf %6, %cst_3 : f32
    %9 = vector.broadcast %7 : f32 to vector<16x128xf32>
    %10 = arith.mulf %0, %9 : vector<16x128xf32>
    %11 = math.roundeven %10 : vector<16x128xf32>
    %cst_4 = arith.constant -3.200000e+01 : f32
    %cst_5 = arith.constant 3.100000e+01 : f32
    %12 = vector.broadcast %cst_4 : f32 to vector<16x128xf32>
    %13 = arith.maximumf %12, %11 : vector<16x128xf32>
    %14 = vector.broadcast %cst_5 : f32 to vector<16x128xf32>
    %15 = arith.minimumf %14, %13 : vector<16x128xf32>
    %c0_6 = arith.constant 0 : index
    %16 = memref.load %arg2[%c0_6] : memref<4xf32, #tpu.memory_space<smem>>
    %c0_7 = arith.constant 0 : index
    %c0_8 = arith.constant 0 : index
    %17 = vector.load %arg4[%c0_7, %c0_8] : memref<64x1xf32, #tpu.memory_space<vmem>>, vector<64x1xf32>
    %18 = vector.broadcast %7 : f32 to vector<64x1xf32>
    %19 = arith.mulf %17, %18 : vector<64x1xf32>
    %20 = math.roundeven %19 : vector<64x1xf32>
    %cst_9 = arith.constant -3.200000e+01 : f32
    %cst_10 = arith.constant 3.100000e+01 : f32
    %21 = vector.broadcast %cst_9 : f32 to vector<64x1xf32>
    %22 = arith.maximumf %21, %20 : vector<64x1xf32>
    %23 = vector.broadcast %cst_10 : f32 to vector<64x1xf32>
    %24 = arith.minimumf %23, %22 : vector<64x1xf32>
    %c0_11 = arith.constant 0 : index
    %c0_12 = arith.constant 0 : index
    %25 = vector.load %arg3[%c0_11, %c0_12] : memref<64x16xbf16, #tpu.memory_space<vmem>>, vector<64x16xbf16>
    %26 = arith.truncf %15 : vector<16x128xf32> to vector<16x128xbf16>
    %cst_13 = arith.constant dense<0.000000e+00> : vector<64x128xf32>
    %27 = tpu.matmul %25, %26, %cst_13 {dimension_numbers = #tpu.dot_dimension_numbers<[1], [0], [0], [1], [0, 0, 1, 1], [], []>} : vector<64x16xbf16>, vector<16x128xbf16>, vector<64x128xf32> -> vector<64x128xf32>
    %28 = vector.broadcast %24 : vector<64x1xf32> to vector<64x128xf32>
    %29 = arith.addf %27, %28 : vector<64x128xf32>
    %30 = arith.mulf %16, %8 : f32
    %31 = vector.broadcast %30 : f32 to vector<64x128xf32>
    %32 = arith.mulf %29, %31 : vector<64x128xf32>
    %cst_14 = arith.constant 0.000000e+00 : f32
    %33 = vector.broadcast %cst_14 : f32 to vector<64x128xf32>
    %34 = arith.maximumf %32, %33 : vector<64x128xf32>
    %35 = vector.shape_cast %34 : vector<64x128xf32> to vector<1x64x128xf32>
    %cst_15 = arith.constant dense<0xFF800000> : vector<1xf32>
    %36 = vector.multi_reduction <maximumf>, %35, %cst_15 [1, 2] : vector<1x64x128xf32> to vector<1xf32>
    %37 = vector.shape_cast %36 : vector<1xf32> to vector<1x1x1xf32>
    %38 = vector.extract %37[0, 0, 0] : f32 from vector<1x1x1xf32>
    %cst_16 = arith.constant 9.99999993E-9 : f32
    %39 = arith.maximumf %38, %cst_16 : f32
    %cst_17 = arith.constant 3.100000e+01 : f32
    %40 = arith.divf %cst_17, %39 : f32
    %cst_18 = arith.constant 0.0322580636 : f32
    %41 = arith.mulf %39, %cst_18 : f32
    %42 = vector.broadcast %40 : f32 to vector<64x128xf32>
    %43 = arith.mulf %34, %42 : vector<64x128xf32>
    %44 = math.roundeven %43 : vector<64x128xf32>
    %cst_19 = arith.constant -3.200000e+01 : f32
    %cst_20 = arith.constant 3.100000e+01 : f32
    %45 = vector.broadcast %cst_19 : f32 to vector<64x128xf32>
    %46 = arith.maximumf %45, %44 : vector<64x128xf32>
    %47 = vector.broadcast %cst_20 : f32 to vector<64x128xf32>
    %48 = arith.minimumf %47, %46 : vector<64x128xf32>
    %c1 = arith.constant 1 : index
    %49 = memref.load %arg2[%c1] : memref<4xf32, #tpu.memory_space<smem>>
    %c0_21 = arith.constant 0 : index
    %c0_22 = arith.constant 0 : index
    %50 = vector.load %arg6[%c0_21, %c0_22] : memref<32x1xf32, #tpu.memory_space<vmem>>, vector<32x1xf32>
    %51 = vector.broadcast %40 : f32 to vector<32x1xf32>
    %52 = arith.mulf %50, %51 : vector<32x1xf32>
    %53 = math.roundeven %52 : vector<32x1xf32>
    %cst_23 = arith.constant -3.200000e+01 : f32
    %cst_24 = arith.constant 3.100000e+01 : f32
    %54 = vector.broadcast %cst_23 : f32 to vector<32x1xf32>
    %55 = arith.maximumf %54, %53 : vector<32x1xf32>
    %56 = vector.broadcast %cst_24 : f32 to vector<32x1xf32>
    %57 = arith.minimumf %56, %55 : vector<32x1xf32>
    %c0_25 = arith.constant 0 : index
    %c0_26 = arith.constant 0 : index
    %58 = vector.load %arg5[%c0_25, %c0_26] : memref<32x64xbf16, #tpu.memory_space<vmem>>, vector<32x64xbf16>
    %59 = arith.truncf %48 : vector<64x128xf32> to vector<64x128xbf16>
    %cst_27 = arith.constant dense<0.000000e+00> : vector<32x128xf32>
    %60 = tpu.matmul %58, %59, %cst_27 {dimension_numbers = #tpu.dot_dimension_numbers<[1], [0], [0], [1], [0, 0, 1, 1], [], []>} : vector<32x64xbf16>, vector<64x128xbf16>, vector<32x128xf32> -> vector<32x128xf32>
    %61 = vector.broadcast %57 : vector<32x1xf32> to vector<32x128xf32>
    %62 = arith.addf %60, %61 : vector<32x128xf32>
    %63 = arith.mulf %49, %41 : f32
    %64 = vector.broadcast %63 : f32 to vector<32x128xf32>
    %65 = arith.mulf %62, %64 : vector<32x128xf32>
    %cst_28 = arith.constant 0.000000e+00 : f32
    %66 = vector.broadcast %cst_28 : f32 to vector<32x128xf32>
    %67 = arith.maximumf %65, %66 : vector<32x128xf32>
    %68 = vector.shape_cast %67 : vector<32x128xf32> to vector<1x32x128xf32>
    %cst_29 = arith.constant dense<0xFF800000> : vector<1xf32>
    %69 = vector.multi_reduction <maximumf>, %68, %cst_29 [1, 2] : vector<1x32x128xf32> to vector<1xf32>
    %70 = vector.shape_cast %69 : vector<1xf32> to vector<1x1x1xf32>
    %71 = vector.extract %70[0, 0, 0] : f32 from vector<1x1x1xf32>
    %cst_30 = arith.constant 9.99999993E-9 : f32
    %72 = arith.maximumf %71, %cst_30 : f32
    %cst_31 = arith.constant 3.100000e+01 : f32
    %73 = arith.divf %cst_31, %72 : f32
    %cst_32 = arith.constant 0.0322580636 : f32
    %74 = arith.mulf %72, %cst_32 : f32
    %75 = vector.broadcast %73 : f32 to vector<32x128xf32>
    %76 = arith.mulf %67, %75 : vector<32x128xf32>
    %77 = math.roundeven %76 : vector<32x128xf32>
    %cst_33 = arith.constant -3.200000e+01 : f32
    %cst_34 = arith.constant 3.100000e+01 : f32
    %78 = vector.broadcast %cst_33 : f32 to vector<32x128xf32>
    %79 = arith.maximumf %78, %77 : vector<32x128xf32>
    %80 = vector.broadcast %cst_34 : f32 to vector<32x128xf32>
    %81 = arith.minimumf %80, %79 : vector<32x128xf32>
    %c2 = arith.constant 2 : index
    %82 = memref.load %arg2[%c2] : memref<4xf32, #tpu.memory_space<smem>>
    %c0_35 = arith.constant 0 : index
    %c0_36 = arith.constant 0 : index
    %83 = vector.load %arg8[%c0_35, %c0_36] : memref<32x1xf32, #tpu.memory_space<vmem>>, vector<32x1xf32>
    %84 = vector.broadcast %73 : f32 to vector<32x1xf32>
    %85 = arith.mulf %83, %84 : vector<32x1xf32>
    %86 = math.roundeven %85 : vector<32x1xf32>
    %cst_37 = arith.constant -3.200000e+01 : f32
    %cst_38 = arith.constant 3.100000e+01 : f32
    %87 = vector.broadcast %cst_37 : f32 to vector<32x1xf32>
    %88 = arith.maximumf %87, %86 : vector<32x1xf32>
    %89 = vector.broadcast %cst_38 : f32 to vector<32x1xf32>
    %90 = arith.minimumf %89, %88 : vector<32x1xf32>
    %c0_39 = arith.constant 0 : index
    %c0_40 = arith.constant 0 : index
    %91 = vector.load %arg7[%c0_39, %c0_40] : memref<32x32xbf16, #tpu.memory_space<vmem>>, vector<32x32xbf16>
    %92 = arith.truncf %81 : vector<32x128xf32> to vector<32x128xbf16>
    %cst_41 = arith.constant dense<0.000000e+00> : vector<32x128xf32>
    %93 = tpu.matmul %91, %92, %cst_41 {dimension_numbers = #tpu.dot_dimension_numbers<[1], [0], [0], [1], [0, 0, 1, 1], [], []>} : vector<32x32xbf16>, vector<32x128xbf16>, vector<32x128xf32> -> vector<32x128xf32>
    %94 = vector.broadcast %90 : vector<32x1xf32> to vector<32x128xf32>
    %95 = arith.addf %93, %94 : vector<32x128xf32>
    %96 = arith.mulf %82, %74 : f32
    %97 = vector.broadcast %96 : f32 to vector<32x128xf32>
    %98 = arith.mulf %95, %97 : vector<32x128xf32>
    %cst_42 = arith.constant 0.000000e+00 : f32
    %99 = vector.broadcast %cst_42 : f32 to vector<32x128xf32>
    %100 = arith.maximumf %98, %99 : vector<32x128xf32>
    %101 = vector.shape_cast %100 : vector<32x128xf32> to vector<1x32x128xf32>
    %cst_43 = arith.constant dense<0xFF800000> : vector<1xf32>
    %102 = vector.multi_reduction <maximumf>, %101, %cst_43 [1, 2] : vector<1x32x128xf32> to vector<1xf32>
    %103 = vector.shape_cast %102 : vector<1xf32> to vector<1x1x1xf32>
    %104 = vector.extract %103[0, 0, 0] : f32 from vector<1x1x1xf32>
    %cst_44 = arith.constant 9.99999993E-9 : f32
    %105 = arith.maximumf %104, %cst_44 : f32
    %cst_45 = arith.constant 3.100000e+01 : f32
    %106 = arith.divf %cst_45, %105 : f32
    %cst_46 = arith.constant 0.0322580636 : f32
    %107 = arith.mulf %105, %cst_46 : f32
    %108 = vector.broadcast %106 : f32 to vector<32x128xf32>
    %109 = arith.mulf %100, %108 : vector<32x128xf32>
    %110 = math.roundeven %109 : vector<32x128xf32>
    %cst_47 = arith.constant -3.200000e+01 : f32
    %cst_48 = arith.constant 3.100000e+01 : f32
    %111 = vector.broadcast %cst_47 : f32 to vector<32x128xf32>
    %112 = arith.maximumf %111, %110 : vector<32x128xf32>
    %113 = vector.broadcast %cst_48 : f32 to vector<32x128xf32>
    %114 = arith.minimumf %113, %112 : vector<32x128xf32>
    %c3 = arith.constant 3 : index
    %115 = memref.load %arg2[%c3] : memref<4xf32, #tpu.memory_space<smem>>
    %c0_49 = arith.constant 0 : index
    %c0_50 = arith.constant 0 : index
    %116 = vector.load %arg10[%c0_49, %c0_50] : memref<8x1xf32, #tpu.memory_space<vmem>>, vector<8x1xf32>
    %117 = vector.broadcast %106 : f32 to vector<8x1xf32>
    %118 = arith.mulf %116, %117 : vector<8x1xf32>
    %119 = math.roundeven %118 : vector<8x1xf32>
    %cst_51 = arith.constant -3.200000e+01 : f32
    %cst_52 = arith.constant 3.100000e+01 : f32
    %120 = vector.broadcast %cst_51 : f32 to vector<8x1xf32>
    %121 = arith.maximumf %120, %119 : vector<8x1xf32>
    %122 = vector.broadcast %cst_52 : f32 to vector<8x1xf32>
    %123 = arith.minimumf %122, %121 : vector<8x1xf32>
    %c0_53 = arith.constant 0 : index
    %c0_54 = arith.constant 0 : index
    %124 = vector.load %arg9[%c0_53, %c0_54] : memref<8x32xbf16, #tpu.memory_space<vmem>>, vector<8x32xbf16>
    %125 = arith.truncf %114 : vector<32x128xf32> to vector<32x128xbf16>
    %cst_55 = arith.constant dense<0.000000e+00> : vector<8x128xf32>
    %126 = tpu.matmul %124, %125, %cst_55 {dimension_numbers = #tpu.dot_dimension_numbers<[1], [0], [0], [1], [0, 0, 1, 1], [], []>} : vector<8x32xbf16>, vector<32x128xbf16>, vector<8x128xf32> -> vector<8x128xf32>
    %127 = vector.broadcast %123 : vector<8x1xf32> to vector<8x128xf32>
    %128 = arith.addf %126, %127 : vector<8x128xf32>
    %129 = arith.mulf %115, %107 : f32
    %130 = vector.broadcast %129 : f32 to vector<8x128xf32>
    %131 = arith.mulf %128, %130 : vector<8x128xf32>
    %132 = tpu.iota {dimensions = array<i32: 0>} : vector<8x128xi32>
    %c5_i32 = arith.constant 5 : i32
    %133 = vector.broadcast %c5_i32 : i32 to vector<8x128xi32>
    %134 = arith.cmpi slt, %132, %133 : vector<8x128xi32>
    %cst_56 = arith.constant -1.000000e+30 : f32
    %135 = vector.broadcast %cst_56 : f32 to vector<8x128xf32>
    %136 = arith.select %134, %131, %135 : vector<8x128xi1>, vector<8x128xf32>
    %cst_57 = arith.constant dense<0xFF800000> : vector<128xf32>
    %137 = vector.multi_reduction <maximumf>, %136, %cst_57 [0] : vector<8x128xf32> to vector<128xf32>
    %138 = vector.shape_cast %137 : vector<128xf32> to vector<1x128xf32>
    %139 = vector.broadcast %138 : vector<1x128xf32> to vector<8x128xf32>
    %140 = arith.subf %136, %139 : vector<8x128xf32>
    %141 = math.exp %140 : vector<8x128xf32>
    %cst_58 = arith.constant dense<0.000000e+00> : vector<128xf32>
    %142 = vector.multi_reduction <add>, %141, %cst_58 [0] : vector<8x128xf32> to vector<128xf32>
    %143 = vector.shape_cast %142 : vector<128xf32> to vector<1x128xf32>
    %cst_59 = arith.constant 1.000000e+00 : f32
    %144 = vector.broadcast %cst_59 : f32 to vector<1x128xf32>
    %145 = arith.divf %144, %143 : vector<1x128xf32>
    %146 = vector.broadcast %145 : vector<1x128xf32> to vector<8x128xf32>
    %147 = arith.mulf %141, %146 : vector<8x128xf32>
    %c0_60 = arith.constant 0 : index
    %c0_61 = arith.constant 0 : index
    %148 = vector.load %arg11[%c0_60, %c0_61] : memref<8x128xf32, #tpu.memory_space<vmem>>, vector<8x128xf32>
    tpu.vector_store %arg11[%c0_60, %c0_61], %147 {strides = array<i32>} : memref<8x128xf32, #tpu.memory_space<vmem>>, vector<8x128xf32>,
    return
  }
  func.func @transform_0(%arg0: i32) -> (i32, i32) {
    %c0_i32 = arith.constant 0 : i32
    %c0_i32_0 = arith.constant 0 : i32
    return %c0_i32, %arg0 : i32, i32
  }
  func.func @transform_1(%arg0: i32) -> i32 {
    %c0_i32 = arith.constant 0 : i32
    %c0_i32_0 = arith.constant 0 : i32
    return %c0_i32 : i32
  }
  func.func @transform_2(%arg0: i32) -> (i32, i32) {
    %c0_i32 = arith.constant 0 : i32
    %c0_i32_0 = arith.constant 0 : i32
    %c0_i32_1 = arith.constant 0 : i32
    return %c0_i32, %c0_i32_0 : i32, i32
  }
  func.func @transform_3(%arg0: i32) -> (i32, i32) {
    %c0_i32 = arith.constant 0 : i32
    %c0_i32_0 = arith.constant 0 : i32
    %c0_i32_1 = arith.constant 0 : i32
    return %c0_i32, %c0_i32_0 : i32, i32
  }
  func.func @transform_4(%arg0: i32) -> (i32, i32) {
    %c0_i32 = arith.constant 0 : i32
    %c0_i32_0 = arith.constant 0 : i32
    %c0_i32_1 = arith.constant 0 : i32
    return %c0_i32, %c0_i32_0 : i32, i32
  }
  func.func @transform_5(%arg0: i32) -> (i32, i32) {
    %c0_i32 = arith.constant 0 : i32
    %c0_i32_0 = arith.constant 0 : i32
    %c0_i32_1 = arith.constant 0 : i32
    return %c0_i32, %c0_i32_0 : i32, i32
  }
  func.func @transform_6(%arg0: i32) -> (i32, i32) {
    %c0_i32 = arith.constant 0 : i32
    %c0_i32_0 = arith.constant 0 : i32
    %c0_i32_1 = arith.constant 0 : i32
    return %c0_i32, %c0_i32_0 : i32, i32
  }
  func.func @transform_7(%arg0: i32) -> (i32, i32) {
    %c0_i32 = arith.constant 0 : i32
    %c0_i32_0 = arith.constant 0 : i32
    %c0_i32_1 = arith.constant 0 : i32
    return %c0_i32, %c0_i32_0 : i32, i32
  }
  func.func @transform_8(%arg0: i32) -> (i32, i32) {
    %c0_i32 = arith.constant 0 : i32
    %c0_i32_0 = arith.constant 0 : i32
    %c0_i32_1 = arith.constant 0 : i32
    return %c0_i32, %c0_i32_0 : i32, i32
  }
  func.func @transform_9(%arg0: i32) -> (i32, i32) {
    %c0_i32 = arith.constant 0 : i32
    %c0_i32_0 = arith.constant 0 : i32
    %c0_i32_1 = arith.constant 0 : i32
    return %c0_i32, %c0_i32_0 : i32, i32
  }
  func.func @transform_10(%arg0: i32) -> (i32, i32) {
    %c0_i32 = arith.constant 0 : i32
    %c0_i32_0 = arith.constant 0 : i32
    return %c0_i32, %arg0 : i32, i32
  }
}

</mosaic_0001>

<bundles_post_ra>
// kernel: tpu_custom_call.1
= control target key start
LH: loop header
LB: loop body
LE: loop exit
PB: predicated region body
PF: predicated region fallthrough
CT: control target
= control target key end

     0   :  { %15 = vsyncpa [#allocation4], 0  ;;  %s1155_s0 = inlined_call_operand.vmem [shape: f32[16,128], index: 0, kind: input, shape index: {}]   ;;  %s1156_s1 = inlined_call_operand.vmem [shape: f32[4], index: 1, kind: input, shape index: {}]   ;;  %s1157_s2 = inlined_call_operand.vmem [shape: bf16[64,16], index: 2, kind: input, shape index: {}]   ;;  %s1158_s3 = inlined_call_operand.vmem [shape: f32[64,1], index: 3, kind: input, shape index: {}]   ;;  %s1159_s4 = inlined_call_operand.vmem [shape: bf16[32,64], index: 4, kind: input, shape index: {}]   ;;  %s1160_s5 = inlined_call_operand.vmem [shape: f32[32,1], index: 5, kind: input, shape index: {}]   ;;  %s1161_s6 = inlined_call_operand.vmem [shape: bf16[32,32], index: 6, kind: input, shape index: {}]   ;;  %s1162_s7 = inlined_call_operand.vmem [shape: f32[32,1], index: 7, kind: input, shape index: {}]   ;;  %s1163_s8 = inlined_call_operand.vmem [shape: bf16[8,32], index: 8, kind: input, shape index: {}]   ;;  %s1164_s9 = inlined_call_operand.vmem [shape: f32[8,1], index: 9, kind: input, shape index: {}]   ;;  %s1165_s10 = inlined_call_operand.hbm [shape: f32[8,128], index: 10, kind: output, shape index: {}]  }
   0x1   :  { %16 = vsyncpa [#allocation3], 0  ;;  %s25_s15 = sshll.u32 %s1156_s1, 4  ;;  %s26_s15 = int_to_ptr.vmem [resolvable:$true] %s25_s15 }
   0x2   :  { %s911_s16 = scalar_lea.vmem %s26_s15, 16  ;;  %p916_p1 = scmp.lt.s32.totalorder %s26_s15, %s26_s15 }
   0x3   :  { %p912_p0 = scmp.ne.s32.totalorder %s26_s15, %s911_s16  ;;  %p917_p2 = scmp.lt.s32.totalorder %s911_s16, %s911_s16 }
   0x5   :  { %p918_p3 = por %p917_p2, %p916_p1 }
   0x7   :  { %p919_p4 = pnand %p918_p3, %p912_p0 }
   0x9   :  { %922 = shalt.err (!%p919_p4)
}
   0xa   :  { %s949_s17 = smov [#allocation2]  }
   0xb   :  { %28 = dma.vmem_to_smem %s26_s15, 16, %s949_s17, [#allocation4]  }
   0xc   :  { %945 = dma.done.wait [#allocation4], 16  }
   0xd   :  { %946 = vsyncadd [#allocation4], 4294967280 }
   0xe   :  { %48 = sfence }
   0xf   :  { %v50_v0 = vld [vmem:[%s1155_s0] sm:$0xff]  ;;  %v51_v1 = vld [vmem:[%s1155_s0 + $0x8] sm:$0xff]  ;;  %v950_v7 = vmov 0   ;;  %vm189_vm0 = vcmask 130048   ;;  %s951_s23 = smov 1e-08  }
  0x10   :  { %v52_v2 = vand.u32 2147483647, %v50_v0  ;;  %v53_v3 = vand.u32 2147483647, %v51_v1  ;;  %890 = vset.pattern.permute.xlu1 %v950_v7  ;;  %889 = vset.pattern.permute.xlu0 %v950_v7  ;;  %v891_v13 = vld [vmem:[%s1157_s2] sm:$0xff]   ;;  %v81_v16 = vld [vmem:[%s1158_s3 + $0x8] sm:$0xff] }
  0x11   :  { %796 = vmatprep.mubr.msk.bf16.mxu0 %vm189_vm0, %v891_v13  ;;  %v80_v17 = vld [vmem:[%s1158_s3] sm:$0xff]  ;;  %v82_v18 = vld [vmem:[%s1158_s3 + $0x10] sm:$0xff]  ;;  %v83_v19 = vld [vmem:[%s1158_s3 + $0x18] sm:$0xff]  ;;  %vm399_vm1 = vcmask 523264   ;;  %vm557_vm2 = vcmask 261120   ;;  %s769_s18 = sld [smem:[#allocation2 + $0x2]] }
  0x12   :  { %v54_v4 = vmax.f32.f32 %v52_v2, %v53_v3  ;;  %v84_v31 = vld [vmem:[%s1158_s3 + $0x20] sm:$0xff]  ;;  %v85_v44 = vld [vmem:[%s1158_s3 + $0x28] sm:$0xff]  ;;  %v893_v51 = vld [vmem:[%s1157_s2 + $0x10] sm:$0xff]   ;;  %vm953_vm3 = vmmov 0  }
  0x13   :  { %v892_v47 = vld [vmem:[%s1157_s2 + $0x8] sm:$0xff]   ;;  %v86_v52 = vld [vmem:[%s1158_s3 + $0x30] sm:$0xff]  ;;  %v87_v57 = vld [vmem:[%s1158_s3 + $0x38] sm:$0xff] }
  0x14   :  { %55 = vmax.xlane.f32.xlu0 %v54_v4  ;;  %v894_v59 = vld [vmem:[%s1157_s2 + $0x18] sm:$0xff]   ;;  %s79_s2 = sld [smem:[#allocation2]] }
  0xa1   :  { %v56_v5 = vpop.xlane.xlu0 %55 }
  0xa2   :  { %v57_v6 = vrot.slane %v56_v5, 4 }
  0xa4   :  { %v58_v8 = vmax.f32 %v56_v5, %v57_v6 }
  0xa6   :  { %v59_v9 = vrot.slane %v58_v8, 2 }
  0xa8   :  { %v60_v10 = vmax.f32 %v58_v8, %v59_v9 }
  0xaa   :  { %v61_v11 = vrot.slane %v60_v10, 1 }
  0xac   :  { %v62_v12 = vmax.f32 %v60_v10, %v61_v11 }
  0xae   :  { %832 = vpush %v62_v12 }
  0xdf   :  { %s833_s0 = spop %832 }
  0xe0   :  { %s1024_s24 = smax.f32 %s951_s23, %s833_s0  ;;  %s764_s0 = sld [smem:[#allocation2 + $0x1]] }
  0xe1   :  { %v65_v14 = vstv %s1024_s24  ;;  %s69_s3 = smul.f32 0.032258064, %s1024_s24 }
  0xe2   :  { %899 = vrcp.f32 %v65_v14 }
  0xe3   :  { %s267_s29 = smul.f32 %s79_s2, %s69_s3 }
  0xe5   :  { %v268_v14 = vstv %s267_s29 }
  0xec   :  { %v900_v15 = vpop.eup %899 }
  0xed   :  { %834 = vpush %v900_v15 }
 0x11e   :  { %s835_s25 = spop %834 }
 0x11f   :  { %s68_s26 = smul.f32 31.0, %s835_s25 }
 0x121   :  { %v70_v20 = vstv %s68_s26 }
 0x122   :  { %v89_v21 = vmul.f32 %v81_v16, %v70_v20  ;;  %v88_v22 = vmul.f32 %v80_v17, %v70_v20  ;;  %v71_v23 = vmul.f32 %v70_v20, %v50_v0  ;;  %v72_v24 = vmul.f32 %v70_v20, %v51_v1 }
 0x123   :  { %v90_v25 = vmul.f32 %v82_v18, %v70_v20  ;;  %v91_v26 = vmul.f32 %v83_v19, %v70_v20  ;;  %v92_v39 = vmul.f32 %v84_v31, %v70_v20  ;;  %v93_v50 = vmul.f32 %v85_v44, %v70_v20 }
 0x124   :  { %v839_v27 = vround.rtne.f32 %v89_v21  ;;  %v838_v28 = vround.rtne.f32 %v88_v22  ;;  %v836_v29 = vround.rtne.f32 %v71_v23  ;;  %v837_v30 = vround.rtne.f32 %v72_v24 }
 0x125   :  { %v840_v32 = vround.rtne.f32 %v90_v25  ;;  %v841_v38 = vround.rtne.f32 %v91_v26  ;;  %v842_v49 = vround.rtne.f32 %v92_v39  ;;  %v843_v55 = vround.rtne.f32 %v93_v50 }
 0x126   :  { %v105_v33 = vmax.f32 %v839_v27, -32.0  ;;  %v104_v34 = vmax.f32 %v838_v28, -32.0  ;;  %v75_v35 = vmax.f32 %v836_v29, -32.0  ;;  %v76_v36 = vmax.f32 %v837_v30, -32.0 }
 0x127   :  { %v106_v37 = vmax.f32 %v840_v32, -32.0  ;;  %v107_v48 = vmax.f32 %v841_v38, -32.0  ;;  %v108_v54 = vmax.f32 %v842_v49, -32.0  ;;  %v94_v56 = vmul.f32 %v86_v52, %v70_v20 }
 0x128   :  { %v113_v40 = vmin.f32 %v105_v33, 31.0  ;;  %v112_v41 = vmin.f32 %v104_v34, 31.0  ;;  %v77_v42 = vmin.f32 %v75_v35, 31.0  ;;  %v78_v43 = vmin.f32 %v76_v36, 31.0 }
 0x129   :  { %v114_v46 = vmin.f32 %v106_v37, 31.0  ;;  %v115_v53 = vmin.f32 %v107_v48, 31.0  ;;  %v116_v58 = vmin.f32 %v108_v54, 31.0  ;;  %v109_v60 = vmax.f32 %v843_v55, -32.0 }
 0x12a   :  { %136 = vperm.xlu1 %890, %v113_v40   ;;  %131 = vperm.xlu0 %889, %v112_v41   ;;  %v128_v45 = vpack.c.bf16 %v78_v43, %v77_v42  ;;  %v844_v61 = vround.rtne.f32 %v94_v56  ;;  %v95_v62 = vmul.f32 %v87_v57, %v70_v20 }
 0x12b   :  { %v117_v63 = vmin.f32 %v109_v60, 31.0  ;;  %v895_v60 = vld [vmem:[%s1159_s4] sm:$0xff]  }
 0x12c   :  { %794 = vmatprep.subr.bf16.mxu0 %v128_v45  ;;  %v110_v0 = vmax.f32 %v844_v61, -32.0  ;;  %v845_v1 = vround.rtne.f32 %v95_v62  ;;  %812 = vmatprep.mubr.msk.bf16.mxu1 %vm399_vm1, %v895_v60 }
 0x12d   :  { %795 = vmatpush3.bf16.msra.mxu0 %v128_v45 }
 0x12e   :  { %141 = vperm.xlu1 %890, %v114_v46   ;;  %v118_v2 = vmin.f32 %v110_v0, 31.0  ;;  %v111_v3 = vmax.f32 %v845_v1, -32.0  ;;  %v342_v0 = vld [vmem:[%s1160_s5 + $0x8] sm:$0xff]  ;;  %v343_v1 = vld [vmem:[%s1160_s5 + $0x10] sm:$0xff] }
 0x130   :  { %797 = vmatmul.mubr.msk.bf16.vlgmr.msra.gmra.mrb[0].mxu0 %vm189_vm0, %v892_v47  ;;  %v119_v4 = vmin.f32 %v111_v3, 31.0 }
 0x131   :  { %800 = vmatprep.mubr.msk.bf16.mxu0 %vm189_vm0, %v893_v51 }
 0x132   :  { %146 = vperm.xlu1 %890, %v115_v53  }
 0x136   :  { %151 = vperm.xlu1 %890, %v116_v58  }
 0x138   :  { %801 = vmatmul.mubr.msk.bf16.gmra.mrb[4].mxu0 %vm189_vm0, %v894_v59 }
 0x13a   :  { %156 = vperm.xlu1 %890, %v117_v63   ;;  %v341_v63 = vld [vmem:[%s1160_s5] sm:$0xff] }
 0x13e   :  { %161 = vperm.xlu1 %890, %v118_v2  }
 0x142   :  { %166 = vperm.xlu1 %890, %v119_v4  }
 0x1a9   :  { %v137_v5 = vpop.permute.xlu1 %136  ;;  %v132_v11 = vpop.permute.xlu0 %131 }
 0x1ad   :  { %v142_v6 = vpop.permute.xlu1 %141 }
 0x1b1   :  { %v147_v7 = vpop.permute.xlu1 %146 }
 0x1b5   :  { %v152_v8 = vpop.permute.xlu1 %151 }
 0x1b9   :  { %v157_v9 = vpop.permute.xlu1 %156 }
 0x1bd   :  { %v162_v20 = vpop.permute.xlu1 %161 }
 0x1c1   :  { %v167_v28 = vpop.permute.xlu1 %166 }
 0x203   :  { %v798_v10 = vpop.f32.mrb[0].mxu0 }
 0x204   :  { %v245_v12 = vadd.f32 %v798_v10, %v142_v6  ;;  %v236_v13 = vpop.f32.mrb[1].mxu0 }
 0x205   :  { %v237_v15 = vadd.f32 %v236_v13, %v132_v11  ;;  %v799_v16 = vpop.f32.mrb[2].mxu0 }
 0x206   :  { %v1064_v17 = vmul.f32 %v268_v14, %v245_v12  ;;  %v248_v18 = vadd.f32 %v799_v16, %v147_v7  ;;  %v239_v19 = vpop.f32.mrb[3].mxu0 }
 0x207   :  { %v269_v21 = vmul.f32 %v268_v14, %v237_v15  ;;  %v240_v22 = vadd.f32 %v239_v19, %v137_v5 }
 0x208   :  { %v272_v23 = vmul.f32 %v268_v14, %v248_v18  ;;  %v279_v40 = vmax.f32 %v1064_v17, 0.0 }
 0x209   :  { %v270_v24 = vmul.f32 %v268_v14, %v240_v22  ;;  %v277_v43 = vmax.f32 %v269_v21, 0.0 }
 0x20a   :  { %v280_v41 = vmax.f32 %v272_v23, 0.0 }
 0x20b   :  { %v802_v25 = vpop.f32.mrb[4].mxu0  ;;  %v278_v44 = vmax.f32 %v270_v24, 0.0 }
 0x20c   :  { %v261_v26 = vadd.f32 %v802_v25, %v162_v20  ;;  %v252_v27 = vpop.f32.mrb[5].mxu0 }
 0x20d   :  { %v253_v29 = vadd.f32 %v252_v27, %v152_v8  ;;  %v803_v30 = vpop.f32.mrb[6].mxu0 }
 0x20e   :  { %v1066_v31 = vmul.f32 %v268_v14, %v261_v26  ;;  %v264_v32 = vadd.f32 %v803_v30, %v167_v28  ;;  %v255_v33 = vpop.f32.mrb[7].mxu0  ;;  %v344_v26 = vld [vmem:[%s1160_s5 + $0x18] sm:$0xff] }
 0x20f   :  { %v273_v34 = vmul.f32 %v268_v14, %v253_v29  ;;  %v256_v35 = vadd.f32 %v255_v33, %v157_v9 }
 0x210   :  { %v283_v36 = vmax.f32 %v1066_v31, 0.0  ;;  %v1069_v37 = vmul.f32 %v268_v14, %v264_v32 }
 0x211   :  { %v281_v38 = vmax.f32 %v273_v34, 0.0  ;;  %v274_v39 = vmul.f32 %v268_v14, %v256_v35 }
 0x212   :  { %v284_v42 = vmax.f32 %v1069_v37, 0.0  ;;  %v287_v46 = vmax.f32 %v279_v40, %v283_v36 }
 0x213   :  { %v282_v45 = vmax.f32 %v274_v39, 0.0  ;;  %v285_v48 = vmax.f32 %v277_v43, %v281_v38 }
 0x214   :  { %v288_v47 = vmax.f32 %v280_v41, %v284_v42 }
 0x215   :  { %v286_v49 = vmax.f32 %v278_v44, %v282_v45 }
 0x216   :  { %v290_v50 = vmax.f32 %v287_v46, %v288_v47 }
 0x217   :  { %v289_v51 = vmax.f32 %v285_v48, %v286_v49 }
 0x219   :  { %v291_v52 = vmax.f32 %v289_v51, %v290_v50 }
 0x21b   :  { %292 = vmax.xlane.f32.xlu1 %v291_v52 }
 0x2a8   :  { %v293_v53 = vpop.xlane.xlu1 %292 }
 0x2a9   :  { %v294_v54 = vrot.slane %v293_v53, 4 }
 0x2ab   :  { %v295_v55 = vmax.f32 %v293_v53, %v294_v54 }
 0x2ad   :  { %v296_v56 = vrot.slane %v295_v55, 2 }
 0x2af   :  { %v297_v57 = vmax.f32 %v295_v55, %v296_v56  ;;  %v896_v56 = vld [vmem:[%s1159_s4 + $0x8] sm:$0xff]  }
 0x2b1   :  { %v298_v58 = vrot.slane %v297_v57, 1 }
 0x2b3   :  { %v299_v59 = vmax.f32 %v297_v57, %v298_v58 }
 0x2b5   :  { %846 = vpush %v299_v59 }
 0x2e6   :  { %s847_s11 = spop %846 }
 0x2e7   :  { %s1082_s12 = smax.f32 %s951_s23, %s847_s11 }
 0x2e8   :  { %v302_v61 = vstv %s1082_s12  ;;  %s306_s25 = smul.f32 0.032258064, %s1082_s12 }
 0x2e9   :  { %901 = vrcp.f32 %v302_v61 }
 0x2ea   :  { %s455_s26 = smul.f32 %s764_s0, %s306_s25  ;;  %s774_s25 = sld [smem:[#allocation2 + $0x3]] }
 0x2f3   :  { %v902_v62 = vpop.eup %901 }
 0x2f4   :  { %848 = vpush %v902_v62 }
 0x325   :  { %s849_s13 = spop %848 }
 0x326   :  { %s305_s14 = smul.f32 31.0, %s849_s13 }
 0x328   :  { %v307_v2 = vstv %s305_s14 }
 0x329   :  { %v345_v3 = vmul.f32 %v341_v63, %v307_v2  ;;  %v308_v4 = vmul.f32 %v307_v2, %v277_v43  ;;  %v309_v5 = vmul.f32 %v307_v2, %v278_v44  ;;  %v346_v6 = vmul.f32 %v342_v0, %v307_v2 }
 0x32a   :  { %v310_v7 = vmul.f32 %v307_v2, %v279_v40  ;;  %v311_v8 = vmul.f32 %v307_v2, %v280_v41  ;;  %v347_v9 = vmul.f32 %v343_v1, %v307_v2  ;;  %v312_v10 = vmul.f32 %v307_v2, %v281_v38 }
 0x32b   :  { %v858_v11 = vround.rtne.f32 %v345_v3  ;;  %v850_v12 = vround.rtne.f32 %v308_v4  ;;  %v851_v13 = vround.rtne.f32 %v309_v5  ;;  %v859_v14 = vround.rtne.f32 %v346_v6 }
 0x32c   :  { %v852_v15 = vround.rtne.f32 %v310_v7  ;;  %v853_v16 = vround.rtne.f32 %v311_v8  ;;  %v313_v17 = vmul.f32 %v307_v2, %v282_v45  ;;  %v860_v21 = vround.rtne.f32 %v347_v9 }
 0x32d   :  { %v353_v18 = vmax.f32 %v858_v11, -32.0  ;;  %v324_v19 = vmax.f32 %v850_v12, -32.0  ;;  %v325_v20 = vmax.f32 %v851_v13, -32.0  ;;  %v354_v22 = vmax.f32 %v859_v14, -32.0 }
 0x32e   :  { %v326_v23 = vmax.f32 %v852_v15, -32.0  ;;  %v327_v24 = vmax.f32 %v853_v16, -32.0  ;;  %v854_v25 = vround.rtne.f32 %v312_v10  ;;  %v855_v33 = vround.rtne.f32 %v313_v17 }
 0x32f   :  { %v357_v27 = vmin.f32 %v353_v18, 31.0  ;;  %v332_v28 = vmin.f32 %v324_v19, 31.0  ;;  %v333_v29 = vmin.f32 %v325_v20, 31.0  ;;  %v348_v38 = vmul.f32 %v344_v26, %v307_v2 }
 0x330   :  { %v334_v30 = vmin.f32 %v326_v23, 31.0  ;;  %v335_v32 = vmin.f32 %v327_v24, 31.0  ;;  %v328_v35 = vmax.f32 %v854_v25, -32.0  ;;  %v314_v39 = vmul.f32 %v307_v2, %v283_v36  ;;  %v897_v24 = vld [vmem:[%s1161_s6] sm:$0xff]  }
 0x331   :  { %371 = vperm.xlu0 %889, %v357_v27   ;;  %v365_v34 = vpack.c.bf16 %v333_v29, %v332_v28  ;;  %v358_v40 = vmin.f32 %v354_v22, 31.0  ;;  %v355_v41 = vmax.f32 %v860_v21, -32.0  ;;  %v329_v43 = vmax.f32 %v855_v33, -32.0  ;;  %820 = vmatprep.mubr.msk.bf16.mxu0 %vm557_vm2, %v897_v24  ;;  %v501_v27 = vld [vmem:[%s1162_s7] sm:$0xff]  ;;  %v502_v28 = vld [vmem:[%s1162_s7 + $0x8] sm:$0xff]  ;;  %v503_v29 = vld [vmem:[%s1162_s7 + $0x10] sm:$0xff] }
 0x332   :  { %v315_v44 = vmul.f32 %v307_v2, %v284_v42  ;;  %v366_v45 = vpack.c.bf16 %v335_v32, %v334_v30  ;;  %v336_v46 = vmin.f32 %v328_v35, 31.0  ;;  %v861_v47 = vround.rtne.f32 %v348_v38 }
 0x333   :  { %804 = vmatprep.subr.bf16.mxu1 %v365_v34  ;;  %v856_v48 = vround.rtne.f32 %v314_v39  ;;  %v337_v49 = vmin.f32 %v329_v43, 31.0  ;;  %v359_v31 = vmin.f32 %v355_v41, 31.0  ;;  %v456_v63 = vstv %s455_s26 }
 0x334   :  { %805 = vmatpush3.bf16.msra.mxu1 %v365_v34  ;;  %v857_v50 = vround.rtne.f32 %v315_v44  ;;  %v356_v53 = vmax.f32 %v861_v47, -32.0 }
 0x335   :  { %376 = vperm.xlu0 %889, %v358_v40   ;;  %806 = vmatprep.subr.bf16.mxu1 %v366_v45  ;;  %v330_v51 = vmax.f32 %v856_v48, -32.0  ;;  %v367_v36 = vpack.c.bf16 %v337_v49, %v336_v46  ;;  %v504_v46 = vld [vmem:[%s1162_s7 + $0x18] sm:$0xff] }
 0x336   :  { %v331_v52 = vmax.f32 %v857_v50, -32.0  ;;  %v360_v42 = vmin.f32 %v356_v53, 31.0 }
 0x337   :  { %v338_v54 = vmin.f32 %v330_v51, 31.0 }
 0x338   :  { %807 = vmatpush3.bf16.msra.mxu1 %v366_v45  ;;  %v339_v37 = vmin.f32 %v331_v52, 31.0 }
 0x339   :  { %381 = vperm.xlu0 %889, %v359_v31   ;;  %808 = vmatprep.subr.bf16.mxu1 %v367_v36 }
 0x33a   :  { %v368_v55 = vpack.c.bf16 %v339_v37, %v338_v54 }
 0x33c   :  { %809 = vmatpush3.bf16.msra.mxu1 %v367_v36 }
 0x33d   :  { %386 = vperm.xlu0 %889, %v360_v42   ;;  %810 = vmatprep.subr.bf16.mxu1 %v368_v55 }
 0x340   :  { %811 = vmatpush3.bf16.msra.mxu1 %v368_v55 }
 0x343   :  { %813 = vmatmul.mubr.msk.bf16.vlgmr.msra.gmra.mrb[0].mxu1 %vm399_vm1, %v896_v56 }
 0x3b0   :  { %v372_v57 = vpop.permute.xlu0 %371 }
 0x3b4   :  { %v377_v58 = vpop.permute.xlu0 %376 }
 0x3b8   :  { %v382_v59 = vpop.permute.xlu0 %381 }
 0x3bc   :  { %v387_v0 = vpop.permute.xlu0 %386 }
 0x416   :  { %v814_v60 = vpop.f32.mrb[0].mxu1 }
 0x417   :  { %v449_v61 = vadd.f32 %v814_v60, %v382_v59  ;;  %v440_v62 = vpop.f32.mrb[1].mxu1 }
 0x418   :  { %v441_v1 = vadd.f32 %v440_v62, %v372_v57  ;;  %v815_v2 = vpop.f32.mrb[2].mxu1 }
 0x419   :  { %v459_v3 = vmul.f32 %v456_v63, %v449_v61  ;;  %v452_v4 = vadd.f32 %v815_v2, %v387_v0  ;;  %v443_v5 = vpop.f32.mrb[3].mxu1  ;;  %v898_v0 = vld [vmem:[%s1161_s6 + $0x8] sm:$0xff]  }
 0x41a   :  { %v457_v6 = vmul.f32 %v456_v63, %v441_v1  ;;  %v444_v7 = vadd.f32 %v443_v5, %v377_v58 }
 0x41b   :  { %v460_v8 = vmul.f32 %v456_v63, %v452_v4  ;;  %v463_v10 = vmax.f32 %v459_v3, 0.0 }
 0x41c   :  { %v458_v9 = vmul.f32 %v456_v63, %v444_v7  ;;  %v461_v12 = vmax.f32 %v457_v6, 0.0 }
 0x41d   :  { %v464_v11 = vmax.f32 %v460_v8, 0.0 }
 0x41e   :  { %v462_v13 = vmax.f32 %v458_v9, 0.0 }
 0x41f   :  { %v466_v14 = vmax.f32 %v463_v10, %v464_v11 }
 0x420   :  { %v465_v15 = vmax.f32 %v461_v12, %v462_v13 }
 0x422   :  { %v467_v16 = vmax.f32 %v465_v15, %v466_v14 }
 0x424   :  { %468 = vmax.xlane.f32.xlu0 %v467_v16 }
 0x4b1   :  { %v469_v17 = vpop.xlane.xlu0 %468 }
 0x4b2   :  { %v470_v18 = vrot.slane %v469_v17, 4 }
 0x4b4   :  { %v471_v19 = vmax.f32 %v469_v17, %v470_v18 }
 0x4b6   :  { %v472_v20 = vrot.slane %v471_v19, 2 }
 0x4b8   :  { %v473_v21 = vmax.f32 %v471_v19, %v472_v20 }
 0x4ba   :  { %v474_v22 = vrot.slane %v473_v21, 1 }
 0x4bc   :  { %v475_v23 = vmax.f32 %v473_v21, %v474_v22 }
 0x4be   :  { %862 = vpush %v475_v23 }
 0x4ef   :  { %s863_s28 = spop %862 }
 0x4f0   :  { %s1111_s2 = smax.f32 %s951_s23, %s863_s28 }
 0x4f1   :  { %v478_v25 = vstv %s1111_s2  ;;  %s482_s19 = smul.f32 0.032258064, %s1111_s2 }
 0x4f2   :  { %903 = vrcp.f32 %v478_v25 }
 0x4f3   :  { %s613_s20 = smul.f32 %s769_s18, %s482_s19 }
 0x4f5   :  { %v614_v9 = vstv %s613_s20 }
 0x4fc   :  { %v904_v26 = vpop.eup %903 }
 0x4fd   :  { %864 = vpush %v904_v26 }
 0x52e   :  { %s865_s3 = spop %864 }
 0x52f   :  { %s481_s29 = smul.f32 31.0, %s865_s3 }
 0x531   :  { %v483_v30 = vstv %s481_s29 }
 0x532   :  { %v505_v32 = vmul.f32 %v501_v27, %v483_v30  ;;  %v484_v33 = vmul.f32 %v483_v30, %v461_v12  ;;  %v485_v34 = vmul.f32 %v483_v30, %v462_v13  ;;  %v506_v35 = vmul.f32 %v502_v28, %v483_v30 }
 0x533   :  { %v486_v38 = vmul.f32 %v483_v30, %v463_v10  ;;  %v487_v39 = vmul.f32 %v483_v30, %v464_v11  ;;  %v507_v40 = vmul.f32 %v503_v29, %v483_v30  ;;  %v508_v53 = vmul.f32 %v504_v46, %v483_v30 }
 0x534   :  { %v870_v41 = vround.rtne.f32 %v505_v32  ;;  %v866_v43 = vround.rtne.f32 %v484_v33  ;;  %v867_v44 = vround.rtne.f32 %v485_v34  ;;  %v871_v45 = vround.rtne.f32 %v506_v35 }
 0x535   :  { %v868_v47 = vround.rtne.f32 %v486_v38  ;;  %v869_v48 = vround.rtne.f32 %v487_v39  ;;  %v872_v36 = vround.rtne.f32 %v507_v40  ;;  %v873_v62 = vround.rtne.f32 %v508_v53  ;;  %v659_v40 = vld [vmem:[%s1164_s9] sm:$0xff] }
 0x536   :  { %v513_v49 = vmax.f32 %v870_v41, -32.0  ;;  %v492_v50 = vmax.f32 %v866_v43, -32.0  ;;  %v493_v51 = vmax.f32 %v867_v44, -32.0  ;;  %v514_v55 = vmax.f32 %v871_v45, -32.0 }
 0x537   :  { %v494_v52 = vmax.f32 %v868_v47, -32.0  ;;  %v495_v31 = vmax.f32 %v869_v48, -32.0  ;;  %v515_v61 = vmax.f32 %v872_v36, -32.0  ;;  %v516_v1 = vmax.f32 %v873_v62, -32.0 }
 0x538   :  { %v517_v54 = vmin.f32 %v513_v49, 31.0  ;;  %v496_v37 = vmin.f32 %v492_v50, 31.0  ;;  %v497_v42 = vmin.f32 %v493_v51, 31.0  ;;  %v518_v59 = vmin.f32 %v514_v55, 31.0 }
 0x539   :  { %v498_v56 = vmin.f32 %v494_v52, 31.0  ;;  %v499_v57 = vmin.f32 %v495_v31, 31.0  ;;  %v519_v63 = vmin.f32 %v515_v61, 31.0  ;;  %v520_v2 = vmin.f32 %v516_v1, 31.0  ;;  %v664_v61 = vld [vmem:[%s1163_s8] sm:$0xf] }
 0x53a   :  { %529 = vperm.xlu1 %890, %v517_v54   ;;  %v525_v58 = vpack.c.bf16 %v497_v42, %v496_v37  ;;  %v952_v35 = vmov 0.0   ;;  %v718_v62 = vlaneseq  ;;  %s954_s8 = smov [#allocation5]  }
 0x53b   :  { %v526_v60 = vpack.c.bf16 %v499_v57, %v498_v56  ;;  %824 = vmatprep.subr.bf16.mxu1 %v952_v35  ;;  %828 = vmatprep.mubr.msk.bf16.mxu1 %vm953_vm3, %v952_v35  ;;  %s747_s27 = sshll.u32 %s954_s8, 4  ;;  %s748_s27 = int_to_ptr.vmem [resolvable:$true] %s747_s27 }
 0x53c   :  { %816 = vmatprep.subr.bf16.mxu0 %v525_v58  ;;  %s923_s28 = scalar_lea.vmem %s748_s27, 128  ;;  %p928_p6 = scmp.lt.s32.totalorder %s748_s27, %s748_s27 }
 0x53d   :  { %817 = vmatpush3.bf16.msra.mxu0 %v525_v58  ;;  %p924_p5 = scmp.ne.s32.totalorder %s748_s27, %s923_s28  ;;  %p929_p7 = scmp.lt.s32.totalorder %s923_s28, %s923_s28 }
 0x53e   :  { %534 = vperm.xlu1 %890, %v518_v59   ;;  %818 = vmatprep.subr.bf16.mxu0 %v526_v60 }
 0x53f   :  { %p930_p8 = por %p929_p7, %p928_p6 }
 0x541   :  { %819 = vmatpush3.bf16.msra.mxu0 %v526_v60  ;;  %p931_p9 = pnand %p930_p8, %p924_p5 }
 0x542   :  { %539 = vperm.xlu1 %890, %v519_v63   ;;  %v719_v63 = vshrl.u32 %v718_v62, 7 }
 0x544   :  { %821 = vmatmul.mubr.msk.bf16.vlgmr.msra.gmra.mrb[8].mxu0 %vm557_vm2, %v898_v0  ;;  %vm720_vm4 = vcmp.lt.s32.totalorder %v719_v63, 5 }
 0x546   :  { %544 = vperm.xlu1 %890, %v520_v2  }
 0x5b9   :  { %v530_v3 = vpop.permute.xlu1 %529 }
 0x5bd   :  { %v535_v4 = vpop.permute.xlu1 %534 }
 0x5c1   :  { %v540_v5 = vpop.permute.xlu1 %539 }
 0x5c5   :  { %v545_v10 = vpop.permute.xlu1 %544 }
 0x617   :  { %v822_v6 = vpop.f32.mrb[8].mxu0 }
 0x618   :  { %v607_v7 = vadd.f32 %v822_v6, %v540_v5  ;;  %v598_v8 = vpop.f32.mrb[9].mxu0 }
 0x619   :  { %v599_v11 = vadd.f32 %v598_v8, %v530_v3  ;;  %v823_v12 = vpop.f32.mrb[10].mxu0 }
 0x61a   :  { %v617_v13 = vmul.f32 %v614_v9, %v607_v7  ;;  %v610_v14 = vadd.f32 %v823_v12, %v545_v10  ;;  %v601_v15 = vpop.f32.mrb[11].mxu0 }
 0x61b   :  { %v615_v16 = vmul.f32 %v614_v9, %v599_v11  ;;  %v602_v17 = vadd.f32 %v601_v15, %v535_v4 }
 0x61c   :  { %v618_v18 = vmul.f32 %v614_v9, %v610_v14  ;;  %v621_v20 = vmax.f32 %v617_v13, 0.0 }
 0x61d   :  { %v616_v19 = vmul.f32 %v614_v9, %v602_v17  ;;  %v619_v22 = vmax.f32 %v615_v16, 0.0 }
 0x61e   :  { %v622_v21 = vmax.f32 %v618_v18, 0.0 }
 0x61f   :  { %v620_v23 = vmax.f32 %v616_v19, 0.0 }
 0x620   :  { %v624_v24 = vmax.f32 %v621_v20, %v622_v21 }
 0x621   :  { %v623_v25 = vmax.f32 %v619_v22, %v620_v23 }
 0x623   :  { %v625_v26 = vmax.f32 %v623_v25, %v624_v24 }
 0x625   :  { %626 = vmax.xlane.f32.xlu1 %v625_v26 }
 0x6b2   :  { %v627_v27 = vpop.xlane.xlu1 %626 }
 0x6b3   :  { %v628_v28 = vrot.slane %v627_v27, 4 }
 0x6b5   :  { %v629_v29 = vmax.f32 %v627_v27, %v628_v28 }
 0x6b7   :  { %v630_v30 = vrot.slane %v629_v29, 2 }
 0x6b9   :  { %v631_v32 = vmax.f32 %v629_v29, %v630_v30 }
 0x6bb   :  { %v632_v33 = vrot.slane %v631_v32, 1 }
 0x6bd   :  { %v633_v34 = vmax.f32 %v631_v32, %v632_v33 }
 0x6bf   :  { %874 = vpush %v633_v34 }
 0x6f0   :  { %s875_s6 = spop %874 }
 0x6f1   :  { %s1132_s21 = smax.f32 %s951_s23, %s875_s6 }
 0x6f2   :  { %v636_v38 = vstv %s1132_s21  ;;  %s640_s26 = smul.f32 0.032258064, %s1132_s21 }
 0x6f3   :  { %905 = vrcp.f32 %v636_v38 }
 0x6f4   :  { %s715_s4 = smul.f32 %s774_s25, %s640_s26 }
 0x6f6   :  { %v716_v4 = vstv %s715_s4 }
 0x6fd   :  { %v906_v39 = vpop.eup %905 }
 0x6fe   :  { %876 = vpush %v906_v39 }
 0x72f   :  { %s877_s1 = spop %876 }
 0x730   :  { %s639_s5 = smul.f32 31.0, %s877_s1 }
 0x732   :  { %v641_v41 = vstv %s639_s5 }
 0x733   :  { %v642_v43 = vmul.f32 %v641_v41, %v619_v22  ;;  %v643_v44 = vmul.f32 %v641_v41, %v620_v23  ;;  %v644_v45 = vmul.f32 %v641_v41, %v621_v20  ;;  %v645_v46 = vmul.f32 %v641_v41, %v622_v21 }
 0x734   :  { %v660_v47 = vmul.f32 %v659_v40, %v641_v41 }
 0x735   :  { %v878_v48 = vround.rtne.f32 %v642_v43  ;;  %v879_v49 = vround.rtne.f32 %v643_v44  ;;  %v880_v50 = vround.rtne.f32 %v644_v45  ;;  %v881_v51 = vround.rtne.f32 %v645_v46 }
 0x736   :  { %v882_v52 = vround.rtne.f32 %v660_v47 }
 0x737   :  { %v650_v31 = vmax.f32 %v878_v48, -32.0  ;;  %v651_v36 = vmax.f32 %v879_v49, -32.0  ;;  %v652_v53 = vmax.f32 %v880_v50, -32.0  ;;  %v653_v54 = vmax.f32 %v881_v51, -32.0 }
 0x738   :  { %v662_v37 = vmax.f32 %v882_v52, -32.0 }
 0x739   :  { %v654_v42 = vmin.f32 %v650_v31, 31.0  ;;  %v655_v55 = vmin.f32 %v651_v36, 31.0  ;;  %v656_v57 = vmin.f32 %v652_v53, 31.0  ;;  %v657_v58 = vmin.f32 %v653_v54, 31.0 }
 0x73a   :  { %v663_v56 = vmin.f32 %v662_v37, 31.0 }
 0x73b   :  { %v665_v59 = vpack.c.bf16 %v655_v55, %v654_v42  ;;  %v666_v60 = vpack.c.bf16 %v657_v58, %v656_v57 }
 0x73c   :  { %669 = vperm.xlu0 %889, %v663_v56  }
 0x73d   :  { %825 = vmatpush3.bf16.msra.mxu1 %v665_v59 }
 0x73e   :  { %826 = vmatprep.subr.bf16.mxu1 %v952_v35 }
 0x741   :  { %827 = vmatpush3.bf16.msra.mxu1 %v666_v60 }
 0x744   :  { %829 = vmatmul.mubr.msk.bf16.vlgmr.msra.gmra.mrb[4].mxu1 %vm557_vm2, %v664_v61 }
 0x7bb   :  { %v670_v0 = vpop.permute.xlu0 %669 }
 0x817   :  { %v709_v1 = vpop.f32.mrb[4].mxu1 }
 0x818   :  { %v710_v2 = vadd.f32 %v709_v1, %v670_v0  ;;  %v830_v3 = vpop.f32.mrb[5].mxu1 }
 0x819   :  { %v712_v5 = vpop.f32.mrb[6].mxu1 }
 0x81a   :  { %v717_v6 = vmul.f32 %v716_v4, %v710_v2  ;;  %v831_v7 = vpop.f32.mrb[7].mxu1 }
 0x81c   :  { %v721_v8 = vsel %vm720_vm4, %v717_v6, -1e+30 }
 0x81d   :  { %v722_v9 = vrot.slane %v721_v8, 4 }
 0x81f   :  { %v723_v10 = vmax.f32 %v721_v8, %v722_v9 }
 0x821   :  { %v724_v11 = vrot.slane %v723_v10, 2 }
 0x823   :  { %v725_v12 = vmax.f32 %v723_v10, %v724_v11 }
 0x825   :  { %v726_v13 = vrot.slane %v725_v12, 1 }
 0x827   :  { %v727_v14 = vmax.f32 %v725_v12, %v726_v13 }
 0x829   :  { %v728_v15 = vsub.f32 %v721_v8, %v727_v14 }
 0x82b   :  { %v729_v16 = vmul.f32 1.442695, %v728_v15 }
 0x82d   :  { %907 = vpow2.f32 %v729_v16 }
 0x837   :  { %v908_v17 = vpop.eup %907 }
 0x838   :  { %v731_v18 = vrot.slane %v908_v17, 4 }
 0x83a   :  { %v732_v19 = vadd.f32 %v908_v17, %v731_v18 }
 0x83c   :  { %v733_v20 = vrot.slane %v732_v19, 2 }
 0x83e   :  { %v734_v21 = vadd.f32 %v733_v20, %v732_v19 }
 0x840   :  { %v735_v22 = vrot.slane %v734_v21, 1 }
 0x842   :  { %v736_v23 = vadd.f32 %v735_v22, %v734_v21 }
 0x844   :  { %909 = vrcp.f32 %v736_v23 }
 0x84e   :  { %v910_v24 = vpop.eup %909 }
 0x84f   :  { %v739_v25 = vmul.f32 %v910_v24, %v908_v17 }
 0x851   :  { %740 = vst [vmem:[#allocation5] sm:$0xff] %v739_v25 }
 0x852   :  { %934 = shalt.err (!%p931_p9)
}
 0x853   :  { %s935_s29 = scalar_lea.hbm %s1165_s10, 128 }
 0x854   :  { %p936_p10 = scmp.ne.s32.totalorder %s1165_s10, %s935_s29  ;;  %p939_p11 = scmp.lt.u32.totalorder %s935_s29, %s1165_s10 }
 0x856   :  { %p941_p12 = pnand %p939_p11, %p936_p10 }
 0x858   :  { %944 = shalt.err (!%p941_p12)
}
 0x859   :  { %750 = dma.vmem_to_hbm [thread:$0]  %s748_s27, 128, %s1165_s10, [#allocation3]  }
 0x85a   :  { %947 = dma.done.wait [#allocation3], 128  }
 0x85b   :  { %948 = vsyncadd [#allocation3], 4294967168 }
 0x85c   :  { %754 = vsyncpa [#allocation3], 1 }
 0x85d   :  { %755 = vsyncpa [#allocation4], 1 }

</bundles_post_ra>
